<compile_context>
chip_gen: v7x
topology: tpu7x:2x2x1
jax: 0.10.0
libtpu: 0.0.40
codegen_flags: <defaults>
</compile_context>

<pallas_src>
from functools import partial

import jax
import jax.numpy as jnp
from jax import lax
from jax.experimental import pallas as pl
from jax.experimental.pallas import tpu as pltpu

BN_EPS = 1e-5
NORM_EPS = 1e-12
NOISE_SCALE = 1e-12
NCORES = 2          # leading "parallel" grid axis in pass 1 (v7x has 2 TensorCores;
                    # on v5e/v6e both shards simply run back-to-back on the single TC)


def _round_up(n, m):
    return ((n + m - 1) // m) * m


def _sigmoid(z):
    # tanh formulation: one EUP op, numerically stable for large |z|.
    return 0.5 * (jnp.tanh(0.5 * z) + 1.0)


# --------------------------------------------------------------------------------------
# Pass 1: h = sigmoid(x1@W0a + x2@W0b + b0)  (stored bf16 for pass 2), plus full-batch
# BatchNorm statistics.  Stats output block (8, Hp) stays resident per core across the
# "arbitrary" batch axis: row 0 = sum(h), row 1 = sum(h*h), masked to true batch rows.
# --------------------------------------------------------------------------------------
def _permnet_layer0_kernel(x1_ref, x2_ref, w0a_ref, w0b_ref, b0_ref,
                           h_ref, stats_ref, *, true_b, tile_b, inner_steps):
    c = pl.program_id(0)
    j = pl.program_id(1)

    @pl.when(j == 0)
    def _init():
        stats_ref[...] = jnp.zeros_like(stats_ref)

    z = (jnp.dot(x1_ref[...], w0a_ref[...], preferred_element_type=jnp.float32)
         + jnp.dot(x2_ref[...], w0b_ref[...], preferred_element_type=jnp.float32)
         + b0_ref[...])
    h = _sigmoid(z)                                    # (TB, Hp) f32
    h_ref[...] = h.astype(h_ref.dtype)                 # bf16 activation reused in pass 2

    # Mask padded batch rows so the full-batch statistics stay exact.
    row = (c * inner_steps + j) * tile_b + lax.broadcasted_iota(jnp.int32, h.shape, 0)
    hm = jnp.where(row < true_b, h, 0.0)
    s = jnp.sum(hm, axis=0, keepdims=True)             # (1, Hp)
    s2 = jnp.sum(hm * hm, axis=0, keepdims=True)       # (1, Hp)
    sel = lax.broadcasted_iota(jnp.int32, stats_ref.shape, 0)     # (8, Hp)
    stats_ref[...] += jnp.where(sel == 0, s, 0.0) + jnp.where(sel == 1, s2, 0.0)


# --------------------------------------------------------------------------------------
# Pass 2: fused BN+BN -> Linear -> ReLU -> double L1 normalization, lane-dense store.
# --------------------------------------------------------------------------------------
def _permnet_apply_kernel(h_ref, mean_ref, scale_ref, w1_ref, b1_ref,
                          acol_ref, arow_ref, d1_ref, d2_ref, out_ref):
    # Fused BatchNorm1d -> BatchNorm1d (affine=False, training-mode, full-batch stats);
    # cast back to bf16 to feed the MXU.
    hn = ((h_ref[...].astype(jnp.float32) - mean_ref[...]) * scale_ref[...]
          ).astype(jnp.bfloat16)

    # layer 1: Linear, then ReLU.  (TB, Kp) with Kp a multiple of 128 (lane dense).
    y = jnp.dot(hn, w1_ref[...], preferred_element_type=jnp.float32) + b1_ref[...]
    m = jnp.maximum(y, 0.0)

    acol = acol_ref[...]    # (Kp, out) column selector (flat j -> matrix column j % out)
    arow = arow_ref[...]    # (Kp, out) row selector    (flat j -> matrix row    j // out)

    # F.normalize(M + 1e-12*rand, p=1, dim=1): per-(b, col) L1 sums.  Values are
    # non-negative (ReLU + non-negative dither) so no abs is needed.
    m = m + d1_ref[...]
    s1 = jnp.dot(m, acol, preferred_element_type=jnp.float32)             # (TB, out)
    inv1 = pl.reciprocal(jnp.maximum(s1, NORM_EPS))                       # (TB, out)
    m = m * lax.dot_general(inv1, acol, (((1,), (1,)), ((), ())),
                            preferred_element_type=jnp.float32)           # (TB, Kp)

    # F.normalize(M + 1e-12*rand, p=1, dim=2): per-(b, row) L1 sums.
    m = m + d2_ref[...]
    s2 = jnp.dot(m, arow, preferred_element_type=jnp.float32)             # (TB, out)
    inv2 = pl.reciprocal(jnp.maximum(s2, NORM_EPS))                       # (TB, out)
    out_ref[...] = m * lax.dot_general(inv2, arow, (((1,), (1,)), ((), ())),
                                       preferred_element_type=jnp.float32)


# --------------------------------------------------------------------------------------
# Wrapper: batch-pad, split W0, two pallas_calls, slice + reshape.
# --------------------------------------------------------------------------------------
@partial(jax.jit, static_argnums=(3,))
def permnet_forward(x1, x2, params, output_size, noise_key):
    w0, b0, w1, b1 = params
    B, D1 = x1.shape
    _, D2 = x2.shape
    H = w0.shape[1]
    out = output_size
    K = out * out
    assert w0.shape[0] == D1 + D2
    assert w1.shape == (H, K), "last layer size must equal output_size**2"

    # Lane-dense padding for the hidden / output feature dims; batch tiling in rows.
    Hp = _round_up(H, 128)
    Kp = _round_up(K, 128)
    TB = min(1024, _round_up(B, 8))        # batch tile (large tiles amortize grid-step cost)
    Bp = _round_up(B, NCORES * TB)
    inner = Bp // (NCORES * TB)

    f32, bf16 = jnp.float32, jnp.bfloat16

    # x1/x2 are only batch-padded (their feature dims are full-extent blocks); the torch
    # concat is avoided by splitting W0 and summing two matmuls in-kernel.
    x1p = jnp.pad(x1.astype(bf16), ((0, Bp - B), (0, 0)))
    x2p = jnp.pad(x2.astype(bf16), ((0, Bp - B), (0, 0)))
    w0a = jnp.zeros((D1, Hp), bf16).at[:, :H].set(w0[:D1].astype(bf16))
    w0b = jnp.zeros((D2, Hp), bf16).at[:, :H].set(w0[D1:].astype(bf16))
    b0p = jnp.zeros((1, Hp), f32).at[0, :H].set(b0.astype(f32))
    w1p = jnp.zeros((Hp, Kp), bf16).at[:H, :K].set(w1.astype(bf16))
    b1p = jnp.zeros((1, Kp), f32).at[0, :K].set(b1.astype(f32))

    # Grid-invariant selector matrices for the flat row-major (out, out) layout; padded
    # flat columns (j >= K) select nothing, so they stay exactly zero in the output.
    jj = jnp.arange(Kp)[:, None]
    gg = jnp.arange(out)[None, :]
    valid = jj < K
    acol = (((jj % out) == gg) & valid).astype(f32)    # (Kp, out)
    arow = (((jj // out) == gg) & valid).astype(f32)   # (Kp, out)

    # TODO(synk): torch.rand_like uses torch's global RNG; the 1e-12 dither here comes
    # from jax.random (same U[0,1) distribution, different bits).
    k1, k2 = jax.random.split(noise_key)
    d1 = jax.random.uniform(k1, (Bp, Kp), f32, 0.0, NOISE_SCALE)
    d2 = jax.random.uniform(k2, (Bp, Kp), f32, 0.0, NOISE_SCALE)

    vmem_limit = 48 * 1024 * 1024    # fits v7x's 64 MiB; comfortable on v5e/v6e (128 MiB)

    # ---- pass 1: layer 0 (Linear + Sigmoid) + full-batch BatchNorm statistics ----
    h, stats = pl.pallas_call(
        partial(_permnet_layer0_kernel, true_b=B, tile_b=TB, inner_steps=inner),
        out_shape=(jax.ShapeDtypeStruct((Bp, Hp), bf16),
                   jax.ShapeDtypeStruct((NCORES * 8, Hp), f32)),
        grid_spec=pltpu.PrefetchScalarGridSpec(
            num_scalar_prefetch=0,
            grid=(NCORES, inner),
            in_specs=[pl.BlockSpec((TB, D1), lambda c, j: (c * inner + j, 0)),
                      pl.BlockSpec((TB, D2), lambda c, j: (c * inner + j, 0)),
                      pl.BlockSpec((D1, Hp), lambda c, j: (0, 0)),
                      pl.BlockSpec((D2, Hp), lambda c, j: (0, 0)),
                      pl.BlockSpec((1, Hp), lambda c, j: (0, 0))],
            out_specs=(pl.BlockSpec((TB, Hp), lambda c, j: (c * inner + j, 0)),
                       pl.BlockSpec((8, Hp), lambda c, j: (c, 0)))),
        compiler_params=pltpu.CompilerParams(
            dimension_semantics=("parallel", "arbitrary"),
            vmem_limit_bytes=vmem_limit),
    )(x1p, x2p, w0a, w0b, b0p)

    # Reduce per-core partial stats; fuse the two consecutive affine-free BatchNorms:
    # second BN sees mean 0 and biased var = var/(var+eps).
    tot = stats.reshape(NCORES, 8, Hp).sum(axis=0)                # (8, Hp)
    mean = tot[0:1] / B                                           # (1, Hp)
    var = jnp.maximum(tot[1:2] / B - mean * mean, 0.0)            # biased var, clamped
    scale = lax.rsqrt(var + BN_EPS) * lax.rsqrt(var / (var + BN_EPS) + BN_EPS)

    # ---- pass 2: BN -> Linear -> ReLU -> double L1 normalization ----
    m_flat = pl.pallas_call(
        _permnet_apply_kernel,
        out_shape=jax.ShapeDtypeStruct((Bp, Kp), f32),
        grid_spec=pltpu.PrefetchScalarGridSpec(
            num_scalar_prefetch=0,
            grid=(Bp // TB,),
            in_specs=[pl.BlockSpec((TB, Hp), lambda i: (i, 0)),
                      pl.BlockSpec((1, Hp), lambda i: (0, 0)),
                      pl.BlockSpec((1, Hp), lambda i: (0, 0)),
                      pl.BlockSpec((Hp, Kp), lambda i: (0, 0)),
                      pl.BlockSpec((1, Kp), lambda i: (0, 0)),
                      pl.BlockSpec((Kp, out), lambda i: (0, 0)),
                      pl.BlockSpec((Kp, out), lambda i: (0, 0)),
                      pl.BlockSpec((TB, Kp), lambda i: (i, 0)),
                      pl.BlockSpec((TB, Kp), lambda i: (i, 0))],
            out_specs=pl.BlockSpec((TB, Kp), lambda i: (i, 0))),
        compiler_params=pltpu.CompilerParams(
            dimension_semantics=("parallel",),   # shards batch tiles over v7x's 2 TCs
            vmem_limit_bytes=vmem_limit),
    )(h, mean, scale, w1p, b1p, acol, arow, d1, d2)

    return m_flat[:B, :K].reshape(B, out, out)


def init_params(key, input_size, layer_sizes):
    """Deterministic PyTorch-style Linear init (uniform +/- 1/sqrt(fan_in)), W stored as W.T."""
    sizes = [input_size] + list(layer_sizes)
    params = []
    for i in range(len(sizes) - 1):
        fan_in, fan_out = sizes[i], sizes[i + 1]
        key, kw, kb = jax.random.split(key, 3)
        bound = 1.0 / (fan_in ** 0.5)
        w = jax.random.uniform(kw, (fan_in, fan_out), jnp.float32, -bound, bound)
        b = jax.random.uniform(kb, (fan_out,), jnp.float32, -bound, bound)
        params.extend([w, b])
    return tuple(params)


if __name__ == "__main__":
    # Small shapes consistent with the module: two MLP layers, last = output_size**2.
    B = 8
    input_size1, input_size2 = 16, 16
    hidden = 16
    output_size = 4
    layer_sizes = [hidden, output_size * output_size]

    key = jax.random.PRNGKey(0)
    kx1, kx2, kp, kn = jax.random.split(key, 4)
    x1 = jax.random.normal(kx1, (B, input_size1), jnp.float32)
    x2 = jax.random.normal(kx2, (B, input_size2), jnp.float32)
    params = init_params(kp, input_size1 + input_size2, layer_sizes)

    M = permnet_forward(x1, x2, params, output_size, kn)
    M = jax.block_until_ready(M)

    assert M.shape == (B, output_size, output_size)
    assert bool(jnp.all(jnp.isfinite(M)))
    assert bool(jnp.all(M >= 0.0))
    # After the dim=2 L1 normalization every (b, r, :) row sums to at most 1
    # (exactly 1 unless the row's L1 mass was below the 1e-12 clamp).
    assert bool(jnp.all(jnp.sum(M, axis=-1) <= 1.0 + 1e-4))
    print("KERNEL_OK")
</pallas_src>

<mosaic_0001>
module attributes {stable_mosaic.version = 11 : i64} {
  func.func @_permnet_layer0_kernel(%arg0: i32, %arg1: i32, %arg2: memref<8x16xbf16, #tpu.memory_space<vmem>>, %arg3: memref<8x16xbf16, #tpu.memory_space<vmem>>, %arg4: memref<16x128xbf16, #tpu.memory_space<vmem>>, %arg5: memref<16x128xbf16, #tpu.memory_space<vmem>>, %arg6: memref<1x128xf32, #tpu.memory_space<vmem>>, %arg7: memref<8x128xbf16, #tpu.memory_space<vmem>>, %arg8: memref<8x128xf32, #tpu.memory_space<vmem>>) attributes {dimension_semantics = [#tpu.dimension_semantics<parallel>, #tpu.dimension_semantics<arbitrary>], iteration_bounds = array<i64: 2, 1>, scalar_prefetch = 0 : i64, scratch_operands = 0 : i64, tpu.core_type = #tpu.core_type<tc>, window_params = [{transform_indices = @transform_0, window_bounds = array<i64: 8, 16>}, {transform_indices = @transform_1, window_bounds = array<i64: 8, 16>}, {pipeline_mode = #tpu.pipeline_mode<synchronous>, transform_indices = @transform_2, window_bounds = array<i64: 16, 128>}, {pipeline_mode = #tpu.pipeline_mode<synchronous>, transform_indices = @transform_3, window_bounds = array<i64: 16, 128>}, {pipeline_mode = #tpu.pipeline_mode<synchronous>, transform_indices = @transform_4, window_bounds = array<i64: 1, 128>}, {transform_indices = @transform_5, window_bounds = array<i64: 8, 128>}, {transform_indices = @transform_6, window_bounds = array<i64: 8, 128>}]} {
    %c0_i32 = arith.constant 0 : i32
    %0 = arith.cmpi eq, %arg1, %c0_i32 : i32
    %1 = arith.extui %0 : i1 to i32
    %c0_i32_0 = arith.constant 0 : i32
    %2 = arith.cmpi ne, %1, %c0_i32_0 : i32
    scf.if %2 {
      %cst_28 = arith.constant 0.000000e+00 : f32
      %54 = vector.broadcast %cst_28 : f32 to vector<8x128xf32>
      %c0_29 = arith.constant 0 : index
      %c0_30 = arith.constant 0 : index
      %55 = vector.load %arg8[%c0_29, %c0_30] : memref<8x128xf32, #tpu.memory_space<vmem>>, vector<8x128xf32>
      tpu.vector_store %arg8[%c0_29, %c0_30], %54 {strides = array<i32>} : memref<8x128xf32, #tpu.memory_space<vmem>>, vector<8x128xf32>,
    } else {
    }
    %c0 = arith.constant 0 : index
    %c0_1 = arith.constant 0 : index
    %3 = vector.load %arg2[%c0, %c0_1] : memref<8x16xbf16, #tpu.memory_space<vmem>>, vector<8x16xbf16>
    %c0_2 = arith.constant 0 : index
    %c0_3 = arith.constant 0 : index
    %4 = vector.load %arg4[%c0_2, %c0_3] : memref<16x128xbf16, #tpu.memory_space<vmem>>, vector<16x128xbf16>
    %cst = arith.constant dense<0.000000e+00> : vector<8x128xf32>
    %5 = tpu.matmul %3, %4, %cst {dimension_numbers = #tpu.dot_dimension_numbers<[1], [0], [0], [1], [0, 0, 1, 1], [], []>} : vector<8x16xbf16>, vector<16x128xbf16>, vector<8x128xf32> -> vector<8x128xf32>
    %c0_4 = arith.constant 0 : index
    %c0_5 = arith.constant 0 : index
    %6 = vector.load %arg3[%c0_4, %c0_5] : memref<8x16xbf16, #tpu.memory_space<vmem>>, vector<8x16xbf16>
    %c0_6 = arith.constant 0 : index
    %c0_7 = arith.constant 0 : index
    %7 = vector.load %arg5[%c0_6, %c0_7] : memref<16x128xbf16, #tpu.memory_space<vmem>>, vector<16x128xbf16>
    %cst_8 = arith.constant dense<0.000000e+00> : vector<8x128xf32>
    %8 = tpu.matmul %6, %7, %cst_8 {dimension_numbers = #tpu.dot_dimension_numbers<[1], [0], [0], [1], [0, 0, 1, 1], [], []>} : vector<8x16xbf16>, vector<16x128xbf16>, vector<8x128xf32> -> vector<8x128xf32>
    %9 = arith.addf %5, %8 : vector<8x128xf32>
    %c0_9 = arith.constant 0 : index
    %c0_10 = arith.constant 0 : index
    %10 = vector.load %arg6[%c0_9, %c0_10] : memref<1x128xf32, #tpu.memory_space<vmem>>, vector<1x128xf32>
    %11 = vector.broadcast %10 : vector<1x128xf32> to vector<8x128xf32>
    %12 = arith.addf %9, %11 : vector<8x128xf32>
    %cst_11 = arith.constant 5.000000e-01 : f32
    %13 = vector.broadcast %cst_11 : f32 to vector<8x128xf32>
    %14 = arith.mulf %13, %12 : vector<8x128xf32>
    %15 = math.tanh %14 : vector<8x128xf32>
    %cst_12 = arith.constant 1.000000e+00 : f32
    %16 = vector.broadcast %cst_12 : f32 to vector<8x128xf32>
    %17 = arith.addf %15, %16 : vector<8x128xf32>
    %cst_13 = arith.constant 5.000000e-01 : f32
    %18 = vector.broadcast %cst_13 : f32 to vector<8x128xf32>
    %19 = arith.mulf %18, %17 : vector<8x128xf32>
    %20 = arith.truncf %19 : vector<8x128xf32> to vector<8x128xbf16>
    %c0_14 = arith.constant 0 : index
    %c0_15 = arith.constant 0 : index
    %21 = vector.load %arg7[%c0_14, %c0_15] : memref<8x128xbf16, #tpu.memory_space<vmem>>, vector<8x128xbf16>
    tpu.vector_store %arg7[%c0_14, %c0_15], %20 {strides = array<i32>} : memref<8x128xbf16, #tpu.memory_space<vmem>>, vector<8x128xbf16>,
    %c1_i32 = arith.constant 1 : i32
    %22 = arith.muli %arg0, %c1_i32 : i32
    %23 = arith.addi %22, %arg1 : i32
    %c8_i32 = arith.constant 8 : i32
    %24 = arith.muli %23, %c8_i32 : i32
    %25 = tpu.iota {dimensions = array<i32: 0>} : vector<8x128xi32>
    %26 = vector.broadcast %24 : i32 to vector<8x128xi32>
    %27 = arith.addi %26, %25 : vector<8x128xi32>
    %c8_i32_16 = arith.constant 8 : i32
    %28 = vector.broadcast %c8_i32_16 : i32 to vector<8x128xi32>
    %29 = arith.cmpi slt, %27, %28 : vector<8x128xi32>
    %cst_17 = arith.constant 0.000000e+00 : f32
    %30 = vector.broadcast %cst_17 : f32 to vector<8x128xf32>
    %31 = arith.select %29, %19, %30 : vector<8x128xi1>, vector<8x128xf32>
    %cst_18 = arith.constant dense<0.000000e+00> : vector<128xf32>
    %32 = vector.multi_reduction <add>, %31, %cst_18 [0] : vector<8x128xf32> to vector<128xf32>
    %33 = vector.shape_cast %32 : vector<128xf32> to vector<1x128xf32>
    %34 = arith.mulf %31, %31 : vector<8x128xf32>
    %cst_19 = arith.constant dense<0.000000e+00> : vector<128xf32>
    %35 = vector.multi_reduction <add>, %34, %cst_19 [0] : vector<8x128xf32> to vector<128xf32>
    %36 = vector.shape_cast %35 : vector<128xf32> to vector<1x128xf32>
    %37 = tpu.iota {dimensions = array<i32: 0>} : vector<8x128xi32>
    %c0_20 = arith.constant 0 : index
    %c0_21 = arith.constant 0 : index
    %38 = vector.load %arg8[%c0_20, %c0_21] : memref<8x128xf32, #tpu.memory_space<vmem>>, vector<8x128xf32>
    %c0_i32_22 = arith.constant 0 : i32
    %39 = vector.broadcast %c0_i32_22 : i32 to vector<8x128xi32>
    %40 = arith.cmpi eq, %37, %39 : vector<8x128xi32>
    %cst_23 = arith.constant 0.000000e+00 : f32
    %41 = vector.shape_cast %33 : vector<1x128xf32> to vector<1x128xf32>
    %42 = vector.broadcast %41 : vector<1x128xf32> to vector<8x128xf32>
    %43 = vector.broadcast %cst_23 : f32 to vector<8x128xf32>
    %44 = arith.select %40, %42, %43 : vector<8x128xi1>, vector<8x128xf32>
    %c1_i32_24 = arith.constant 1 : i32
    %45 = vector.broadcast %c1_i32_24 : i32 to vector<8x128xi32>
    %46 = arith.cmpi eq, %37, %45 : vector<8x128xi32>
    %cst_25 = arith.constant 0.000000e+00 : f32
    %47 = vector.shape_cast %36 : vector<1x128xf32> to vector<1x128xf32>
    %48 = vector.broadcast %47 : vector<1x128xf32> to vector<8x128xf32>
    %49 = vector.broadcast %cst_25 : f32 to vector<8x128xf32>
    %50 = arith.select %46, %48, %49 : vector<8x128xi1>, vector<8x128xf32>
    %51 = arith.addf %44, %50 : vector<8x128xf32>
    %52 = arith.addf %38, %51 : vector<8x128xf32>
    %c0_26 = arith.constant 0 : index
    %c0_27 = arith.constant 0 : index
    %53 = vector.load %arg8[%c0_26, %c0_27] : memref<8x128xf32, #tpu.memory_space<vmem>>, vector<8x128xf32>
    tpu.vector_store %arg8[%c0_26, %c0_27], %52 {strides = array<i32>} : memref<8x128xf32, #tpu.memory_space<vmem>>, vector<8x128xf32>,
    return
  }
  func.func @transform_0(%arg0: i32, %arg1: i32) -> (i32, i32) {
    %c1_i32 = arith.constant 1 : i32
    %0 = arith.muli %arg0, %c1_i32 : i32
    %1 = arith.addi %0, %arg1 : i32
    %c0_i32 = arith.constant 0 : i32
    %c0_i32_0 = arith.constant 0 : i32
    return %1, %c0_i32 : i32, i32
  }
  func.func @transform_1(%arg0: i32, %arg1: i32) -> (i32, i32) {
    %c1_i32 = arith.constant 1 : i32
    %0 = arith.muli %arg0, %c1_i32 : i32
    %1 = arith.addi %0, %arg1 : i32
    %c0_i32 = arith.constant 0 : i32
    %c0_i32_0 = arith.constant 0 : i32
    return %1, %c0_i32 : i32, i32
  }
  func.func @transform_2(%arg0: i32, %arg1: i32) -> (i32, i32) {
    %c0_i32 = arith.constant 0 : i32
    %c0_i32_0 = arith.constant 0 : i32
    %c0_i32_1 = arith.constant 0 : i32
    return %c0_i32, %c0_i32_0 : i32, i32
  }
  func.func @transform_3(%arg0: i32, %arg1: i32) -> (i32, i32) {
    %c0_i32 = arith.constant 0 : i32
    %c0_i32_0 = arith.constant 0 : i32
    %c0_i32_1 = arith.constant 0 : i32
    return %c0_i32, %c0_i32_0 : i32, i32
  }
  func.func @transform_4(%arg0: i32, %arg1: i32) -> (i32, i32) {
    %c0_i32 = arith.constant 0 : i32
    %c0_i32_0 = arith.constant 0 : i32
    %c0_i32_1 = arith.constant 0 : i32
    return %c0_i32, %c0_i32_0 : i32, i32
  }
  func.func @transform_5(%arg0: i32, %arg1: i32) -> (i32, i32) {
    %c1_i32 = arith.constant 1 : i32
    %0 = arith.muli %arg0, %c1_i32 : i32
    %1 = arith.addi %0, %arg1 : i32
    %c0_i32 = arith.constant 0 : i32
    %c0_i32_0 = arith.constant 0 : i32
    return %1, %c0_i32 : i32, i32
  }
  func.func @transform_6(%arg0: i32, %arg1: i32) -> (i32, i32) {
    %c0_i32 = arith.constant 0 : i32
    %c0_i32_0 = arith.constant 0 : i32
    return %arg0, %c0_i32 : i32, i32
  }
}

module attributes {stable_mosaic.version = 11 : i64} {
  func.func @_permnet_apply_kernel(%arg0: i32, %arg1: memref<8x128xbf16, #tpu.memory_space<vmem>>, %arg2: memref<1x128xf32, #tpu.memory_space<vmem>>, %arg3: memref<1x128xf32, #tpu.memory_space<vmem>>, %arg4: memref<128x128xbf16, #tpu.memory_space<vmem>>, %arg5: memref<1x128xf32, #tpu.memory_space<vmem>>, %arg6: memref<128x4xf32, #tpu.memory_space<vmem>>, %arg7: memref<128x4xf32, #tpu.memory_space<vmem>>, %arg8: memref<8x128xf32, #tpu.memory_space<vmem>>, %arg9: memref<8x128xf32, #tpu.memory_space<vmem>>, %arg10: memref<8x128xf32, #tpu.memory_space<vmem>>) attributes {dimension_semantics = [#tpu.dimension_semantics<parallel>], iteration_bounds = array<i64: 2>, scalar_prefetch = 0 : i64, scratch_operands = 0 : i64, tpu.core_type = #tpu.core_type<tc>, window_params = [{transform_indices = @transform_0, window_bounds = array<i64: 8, 128>}, {pipeline_mode = #tpu.pipeline_mode<synchronous>, transform_indices = @transform_1, window_bounds = array<i64: 1, 128>}, {pipeline_mode = #tpu.pipeline_mode<synchronous>, transform_indices = @transform_2, window_bounds = array<i64: 1, 128>}, {pipeline_mode = #tpu.pipeline_mode<synchronous>, transform_indices = @transform_3, window_bounds = array<i64: 128, 128>}, {pipeline_mode = #tpu.pipeline_mode<synchronous>, transform_indices = @transform_4, window_bounds = array<i64: 1, 128>}, {pipeline_mode = #tpu.pipeline_mode<synchronous>, transform_indices = @transform_5, window_bounds = array<i64: 128, 4>}, {pipeline_mode = #tpu.pipeline_mode<synchronous>, transform_indices = @transform_6, window_bounds = array<i64: 128, 4>}, {transform_indices = @transform_7, window_bounds = array<i64: 8, 128>}, {transform_indices = @transform_8, window_bounds = array<i64: 8, 128>}, {transform_indices = @transform_9, window_bounds = array<i64: 8, 128>}]} {
    %c0 = arith.constant 0 : index
    %c0_0 = arith.constant 0 : index
    %0 = vector.load %arg1[%c0, %c0_0] : memref<8x128xbf16, #tpu.memory_space<vmem>>, vector<8x128xbf16>
    %1 = arith.extf %0 : vector<8x128xbf16> to vector<8x128xf32>
    %c0_1 = arith.constant 0 : index
    %c0_2 = arith.constant 0 : index
    %2 = vector.load %arg2[%c0_1, %c0_2] : memref<1x128xf32, #tpu.memory_space<vmem>>, vector<1x128xf32>
    %3 = vector.broadcast %2 : vector<1x128xf32> to vector<8x128xf32>
    %4 = arith.subf %1, %3 : vector<8x128xf32>
    %c0_3 = arith.constant 0 : index
    %c0_4 = arith.constant 0 : index
    %5 = vector.load %arg3[%c0_3, %c0_4] : memref<1x128xf32, #tpu.memory_space<vmem>>, vector<1x128xf32>
    %6 = vector.broadcast %5 : vector<1x128xf32> to vector<8x128xf32>
    %7 = arith.mulf %4, %6 : vector<8x128xf32>
    %8 = arith.truncf %7 : vector<8x128xf32> to vector<8x128xbf16>
    %c0_5 = arith.constant 0 : index
    %c0_6 = arith.constant 0 : index
    %9 = vector.load %arg4[%c0_5, %c0_6] : memref<128x128xbf16, #tpu.memory_space<vmem>>, vector<128x128xbf16>
    %cst = arith.constant dense<0.000000e+00> : vector<8x128xf32>
    %10 = tpu.matmul %8, %9, %cst {dimension_numbers = #tpu.dot_dimension_numbers<[1], [0], [0], [1], [0, 0, 1, 1], [], []>} : vector<8x128xbf16>, vector<128x128xbf16>, vector<8x128xf32> -> vector<8x128xf32>
    %c0_7 = arith.constant 0 : index
    %c0_8 = arith.constant 0 : index
    %11 = vector.load %arg5[%c0_7, %c0_8] : memref<1x128xf32, #tpu.memory_space<vmem>>, vector<1x128xf32>
    %12 = vector.broadcast %11 : vector<1x128xf32> to vector<8x128xf32>
    %13 = arith.addf %10, %12 : vector<8x128xf32>
    %cst_9 = arith.constant 0.000000e+00 : f32
    %14 = vector.broadcast %cst_9 : f32 to vector<8x128xf32>
    %15 = arith.maximumf %13, %14 : vector<8x128xf32>
    %c0_10 = arith.constant 0 : index
    %c0_11 = arith.constant 0 : index
    %16 = vector.load %arg6[%c0_10, %c0_11] : memref<128x4xf32, #tpu.memory_space<vmem>>, vector<128x4xf32>
    %c0_12 = arith.constant 0 : index
    %c0_13 = arith.constant 0 : index
    %17 = vector.load %arg7[%c0_12, %c0_13] : memref<128x4xf32, #tpu.memory_space<vmem>>, vector<128x4xf32>
    %c0_14 = arith.constant 0 : index
    %c0_15 = arith.constant 0 : index
    %18 = vector.load %arg8[%c0_14, %c0_15] : memref<8x128xf32, #tpu.memory_space<vmem>>, vector<8x128xf32>
    %19 = arith.addf %15, %18 : vector<8x128xf32>
    %cst_16 = arith.constant dense<0.000000e+00> : vector<8x4xf32>
    %20 = tpu.matmul %19, %16, %cst_16 {dimension_numbers = #tpu.dot_dimension_numbers<[1], [0], [0], [1], [0, 0, 1, 1], [], []>} : vector<8x128xf32>, vector<128x4xf32>, vector<8x4xf32> -> vector<8x4xf32>
    %cst_17 = arith.constant 9.99999996E-13 : f32
    %21 = vector.broadcast %cst_17 : f32 to vector<8x4xf32>
    %22 = arith.maximumf %20, %21 : vector<8x4xf32>
    %23 = tpu.reciprocal %22 : vector<8x4xf32> -> vector<8x4xf32>
    %cst_18 = arith.constant dense<0.000000e+00> : vector<8x128xf32>
    %24 = tpu.matmul %23, %16, %cst_18 {dimension_numbers = #tpu.dot_dimension_numbers<[1], [1], [0], [0], [0, 0, 1, 0], [], []>} : vector<8x4xf32>, vector<128x4xf32>, vector<8x128xf32> -> vector<8x128xf32>
    %25 = arith.mulf %19, %24 : vector<8x128xf32>
    %c0_19 = arith.constant 0 : index
    %c0_20 = arith.constant 0 : index
    %26 = vector.load %arg9[%c0_19, %c0_20] : memref<8x128xf32, #tpu.memory_space<vmem>>, vector<8x128xf32>
    %27 = arith.addf %25, %26 : vector<8x128xf32>
    %cst_21 = arith.constant dense<0.000000e+00> : vector<8x4xf32>
    %28 = tpu.matmul %27, %17, %cst_21 {dimension_numbers = #tpu.dot_dimension_numbers<[1], [0], [0], [1], [0, 0, 1, 1], [], []>} : vector<8x128xf32>, vector<128x4xf32>, vector<8x4xf32> -> vector<8x4xf32>
    %cst_22 = arith.constant 9.99999996E-13 : f32
    %29 = vector.broadcast %cst_22 : f32 to vector<8x4xf32>
    %30 = arith.maximumf %28, %29 : vector<8x4xf32>
    %31 = tpu.reciprocal %30 : vector<8x4xf32> -> vector<8x4xf32>
    %cst_23 = arith.constant dense<0.000000e+00> : vector<8x128xf32>
    %32 = tpu.matmul %31, %17, %cst_23 {dimension_numbers = #tpu.dot_dimension_numbers<[1], [1], [0], [0], [0, 0, 1, 0], [], []>} : vector<8x4xf32>, vector<128x4xf32>, vector<8x128xf32> -> vector<8x128xf32>
    %33 = arith.mulf %27, %32 : vector<8x128xf32>
    %c0_24 = arith.constant 0 : index
    %c0_25 = arith.constant 0 : index
    %34 = vector.load %arg10[%c0_24, %c0_25] : memref<8x128xf32, #tpu.memory_space<vmem>>, vector<8x128xf32>
    tpu.vector_store %arg10[%c0_24, %c0_25], %33 {strides = array<i32>} : memref<8x128xf32, #tpu.memory_space<vmem>>, vector<8x128xf32>,
    return
  }
  func.func @transform_0(%arg0: i32) -> (i32, i32) {
    %c0_i32 = arith.constant 0 : i32
    %c0_i32_0 = arith.constant 0 : i32
    return %arg0, %c0_i32 : i32, i32
  }
  func.func @transform_1(%arg0: i32) -> (i32, i32) {
    %c0_i32 = arith.constant 0 : i32
    %c0_i32_0 = arith.constant 0 : i32
    %c0_i32_1 = arith.constant 0 : i32
    return %c0_i32, %c0_i32_0 : i32, i32
  }
  func.func @transform_2(%arg0: i32) -> (i32, i32) {
    %c0_i32 = arith.constant 0 : i32
    %c0_i32_0 = arith.constant 0 : i32
    %c0_i32_1 = arith.constant 0 : i32
    return %c0_i32, %c0_i32_0 : i32, i32
  }
  func.func @transform_3(%arg0: i32) -> (i32, i32) {
    %c0_i32 = arith.constant 0 : i32
    %c0_i32_0 = arith.constant 0 : i32
    %c0_i32_1 = arith.constant 0 : i32
    return %c0_i32, %c0_i32_0 : i32, i32
  }
  func.func @transform_4(%arg0: i32) -> (i32, i32) {
    %c0_i32 = arith.constant 0 : i32
    %c0_i32_0 = arith.constant 0 : i32
    %c0_i32_1 = arith.constant 0 : i32
    return %c0_i32, %c0_i32_0 : i32, i32
  }
  func.func @transform_5(%arg0: i32) -> (i32, i32) {
    %c0_i32 = arith.constant 0 : i32
    %c0_i32_0 = arith.constant 0 : i32
    %c0_i32_1 = arith.constant 0 : i32
    return %c0_i32, %c0_i32_0 : i32, i32
  }
  func.func @transform_6(%arg0: i32) -> (i32, i32) {
    %c0_i32 = arith.constant 0 : i32
    %c0_i32_0 = arith.constant 0 : i32
    %c0_i32_1 = arith.constant 0 : i32
    return %c0_i32, %c0_i32_0 : i32, i32
  }
  func.func @transform_7(%arg0: i32) -> (i32, i32) {
    %c0_i32 = arith.constant 0 : i32
    %c0_i32_0 = arith.constant 0 : i32
    return %arg0, %c0_i32 : i32, i32
  }
  func.func @transform_8(%arg0: i32) -> (i32, i32) {
    %c0_i32 = arith.constant 0 : i32
    %c0_i32_0 = arith.constant 0 : i32
    return %arg0, %c0_i32 : i32, i32
  }
  func.func @transform_9(%arg0: i32) -> (i32, i32) {
    %c0_i32 = arith.constant 0 : i32
    %c0_i32_0 = arith.constant 0 : i32
    return %arg0, %c0_i32 : i32, i32
  }
}

</mosaic_0001>

<bundles_post_ra>
// kernel: permnet_forward.4
= control target key start
LH: loop header
LB: loop body
LE: loop exit
PB: predicated region body
PF: predicated region fallthrough
CT: control target
= control target key end

     0   :  { %s692_s21 = smov 0   ;;  %s694_s22 = smov 0   ;;  %s754_s0 = inlined_call_operand.vmem [shape: bf16[16,16], index: 0, kind: input, shape index: {}]   ;;  %s755_s1 = inlined_call_operand.vmem [shape: bf16[16,16], index: 1, kind: input, shape index: {}]   ;;  %s756_s2 = inlined_call_operand.vmem [shape: bf16[16,128], index: 2, kind: input, shape index: {}]   ;;  %s757_s3 = inlined_call_operand.vmem [shape: bf16[16,128], index: 3, kind: input, shape index: {}]   ;;  %s758_s4 = inlined_call_operand.vmem [shape: f32[1,128], index: 4, kind: input, shape index: {}]   ;;  %s759_s5 = inlined_call_operand.vmem [shape: bf16[16,128], index: 5, kind: output, shape index: {0}]   ;;  %s760_s6 = inlined_call_operand.vmem [shape: f32[16,128], index: 6, kind: output, shape index: {1}]  }
   0x1   :  { %s696_s23 = smov 0  }
   0x2 LB: > { %s29_s24 = sadd.s32 1, %s649_s22  ;;  %p572_p0 = scmp.ge.s32.totalorder %s653_s23, 1  ;;  %s653_s23 = sphi %s696_s23, %s17_s23   ;;  %s649_s22 = sphi %s694_s22, %s762_s22   ;;  %s645_s21 = sphi %s692_s21, %s761_s21  }
   0x3   : > { %p31_p1 = scmp.ge.s32.totalorder %s29_s24, 2  ;;  %p245_p2 = scmp.lt.s32.totalorder %s653_s23, 3 }
   0x5   : > { %s764_s24 = smov (%p31_p1, %s29_s24), 0  ;;  %p246_p3 = pnand %p572_p0, %p245_p2 }
   0x6   : > { %v627_v0 = vld [vmem:[%s757_s3] sm:$0xff] (!%p246_p3)   ;;  %v655_v1 = vmov (!%p246_p3), 0.0   ;;  %vm656_vm0 = vmmov (!%p246_p3), 0   ;;  %p285_p4 = scmp.lt.s32.totalorder (!%p246_p3), %s645_s21, 1  ;;  %vm324_vm1 = vcmask (!%p246_p3), 130048   ;;  %v433_v17 = vlaneseq (!%p246_p3)  ;;  %s582_s15 = sshll.u32 (!%p246_p3), %s645_s21, 3 }
   0x7   : > { %249 = sbr.rel (%p246_p3) target bundleno = 272 (0x110), region = 40  ;;  %589 = vmatprep.subr.bf16.mxu0 (!%p246_p3), %v655_v1  ;;  %595 = vmatprep.subr.bf16.mxu1 (!%p246_p3), %v655_v1  ;;  %v628_v2 = vld [vmem:[%s756_s2] sm:$0xff] (!%p246_p3)   ;;  %v435_v19 = vstv (!%p246_p3), %s582_s15 }
   0x8   : > { %590 = vmatpush3.bf16.msra.mxu0 (!%p246_p3), %v627_v0  ;;  %591 = vmatprep.mubr.msk.bf16.mxu0 (!%p246_p3), %vm656_vm0, %v655_v1  ;;  %v581_v7 = vld [vmem:[%s758_s4] ss:$0 sm:$0xff] (!%p246_p3)  ;;  %v434_v18 = vshrl.u32 (!%p246_p3), %v433_v17, 7 }
   0x9   : > { %596 = vmatpush3.bf16.msra.mxu1 (!%p246_p3), %v628_v2  ;;  %597 = vmatprep.mubr.msk.bf16.mxu1 (!%p246_p3), %vm656_vm0, %v655_v1 }
   0xa   : > { %v436_v20 = vadd.s32 (!%p246_p3), %v435_v19, %v434_v18  ;;  %vm453_vm3 = vcmp.eq.s32.totalorder (!%p246_p3), %v434_v18, 0  ;;  %vm455_vm4 = vcmp.eq.s32.totalorder (!%p246_p3), %v434_v18, 1 }
   0xc   : > { %vm437_vm2 = vcmp.lt.s32.totalorder (!%p246_p3), %v436_v20, 8 }
   0xe   : > { %s720_s29 = scalar_select %p285_p4, %s645_s21, 1 }
  0x10   : > { %s723_s30 = sshll.u32 %s720_s29, 2  ;;  %s576_s19 = sshll.u32 %s720_s29, 3 }
  0x11   : > { %s294_s9 = scalar_lea.vmem %s755_s1, %s723_s30  ;;  %s288_s12 = scalar_lea.vmem %s754_s0, %s723_s30 }
  0x12   : > { %v315_v3 = vld [vmem:[%s294_s9] sm:$0xf]  ;;  %s300_s18 = scalar_lea.vmem %s759_s5, %s723_s30  ;;  %s305_s25 = scalar_lea.vmem %s760_s6, %s576_s19 }
  0x13   : > { %592 = vmatmul.mubr.msk.bf16.vlgmr.msra.gmra.mrb[0].mxu0 %vm324_vm1, %v315_v3  ;;  %v312_v4 = vld [vmem:[%s288_s12] sm:$0xf] }
  0x14   : > { %598 = vmatmul.mubr.msk.bf16.vlgmr.msra.gmra.mrb[0].mxu1 %vm324_vm1, %v312_v4 }
  0xe6   : > { %v362_v5 = vpop.f32.mrb[0].mxu0 }
  0xe7   : > { %v411_v6 = vpop.f32.mrb[0].mxu1  ;;  %v593_v8 = vpop.f32.mrb[1].mxu0 }
  0xe8   : > { %v412_v9 = vadd.f32 %v411_v6, %v362_v5  ;;  %v599_v10 = vpop.f32.mrb[1].mxu1  ;;  %v365_v11 = vpop.f32.mrb[2].mxu0 }
  0xe9   : > { %v414_v12 = vpop.f32.mrb[2].mxu1  ;;  %v594_v13 = vpop.f32.mrb[3].mxu0 }
  0xea   : > { %v424_v14 = vadd.f32 %v581_v7, %v412_v9  ;;  %v600_v15 = vpop.f32.mrb[3].mxu1 }
  0xec   : > { %v425_v16 = vmul.f32 0.5, %v424_v14 }
  0xee   : > { %629 = vtanh.f32 %v425_v16 }
  0xf8   : > { %v630_v21 = vpop.eup %629 }
  0xf9   : > { %v427_v22 = vadd.f32 1.0, %v630_v21 }
  0xfb   : > { %v428_v23 = vmul.f32 0.5, %v427_v22 }
  0xfd   : > { %v429_v24 = vpack.c.bf16 %v428_v23, %v428_v23  ;;  %v438_v25 = vsel %vm437_vm2, %v428_v23, 0.0 }
  0xfe   : > { %v439_v26 = vrot.slane %v438_v25, 4  ;;  %v445_v27 = vmul.f32 %v438_v25, %v438_v25 }
  0xff   : > { %430 = vst [vmem:[%s300_s18] sm:$0xf] %v429_v24 }
 0x100   : > { %v440_v28 = vadd.f32 %v439_v26, %v438_v25  ;;  %v446_v29 = vrot.slane %v445_v27, 4 }
 0x102   : > { %v441_v30 = vrot.slane %v440_v28, 2  ;;  %v447_v31 = vadd.f32 %v446_v29, %v445_v27 }
 0x104   : > { %v442_v32 = vadd.f32 %v441_v30, %v440_v28  ;;  %v448_v33 = vrot.slane %v447_v31, 2 }
 0x106   : > { %v443_v34 = vrot.slane %v442_v32, 1  ;;  %v449_v35 = vadd.f32 %v448_v33, %v447_v31 }
 0x108   : > { %v444_v36 = vadd.f32 %v443_v34, %v442_v32  ;;  %v450_v37 = vrot.slane %v449_v35, 1 }
 0x10a   : > { %v451_v38 = vadd.f32 %v450_v37, %v449_v35  ;;  %v454_v39 = vsel %vm453_vm3, %v444_v36, 0.0 }
 0x10c   : > { %v456_v40 = vsel %vm455_vm4, %v451_v38, 0.0 }
 0x10d   : > { %v457_v41 = vadd.f32 %v456_v40, %v454_v39 }
 0x10f   : > { %459 = vst [vmem:[%s305_s25] sm:$0xff] %v457_v41 }
 0x110 PF: > { %s17_s23 = sadd.s32 1, %s653_s23   ;;  %s761_s21 = smov %s649_s22 }
 0x111   : > { %p14_p5 = scmp.ge.s32.totalorder %s17_s23, 4   ;;  %s762_s22 = smov %s764_s24 }
 0x113   :  { %16 = sbr.rel (!%p14_p5) target bundleno = 2 (0x2), region = 89 }

// kernel: permnet_forward.5
= control target key start
LH: loop header
LB: loop body
LE: loop exit
PB: predicated region body
PF: predicated region fallthrough
CT: control target
= control target key end

     0   :  { %s1486_s30 = smov 0   ;;  %s1741_s0 = inlined_call_operand.vmem [shape: bf16[16,128], index: 0, kind: input, shape index: {}]   ;;  %s1742_s1 = inlined_call_operand.vmem [shape: f32[1,128], index: 1, kind: input, shape index: {}]   ;;  %s1743_s2 = inlined_call_operand.vmem [shape: f32[1,128], index: 2, kind: input, shape index: {}]   ;;  %s1744_s3 = inlined_call_operand.vmem [shape: bf16[128,128], index: 3, kind: input, shape index: {}]   ;;  %s1745_s4 = inlined_call_operand.vmem [shape: f32[1,128], index: 4, kind: input, shape index: {}]   ;;  %s1746_s5 = inlined_call_operand.vmem [shape: f32[128,4], index: 5, kind: input, shape index: {}]   ;;  %s1747_s6 = inlined_call_operand.vmem [shape: f32[128,4], index: 6, kind: input, shape index: {}]   ;;  %s1748_s7 = inlined_call_operand.vmem [shape: f32[16,128], index: 7, kind: input, shape index: {}]   ;;  %s1749_s8 = inlined_call_operand.vmem [shape: f32[16,128], index: 8, kind: input, shape index: {}]   ;;  %s1750_s9 = inlined_call_operand.vmem [shape: f32[16,128], index: 9, kind: output, shape index: {}]  }
   0x1 LB: > { %s997_s10 = sadd.s32 4294967295, %s1431_s30   ;;  %p1001_p0 = scmp.ge.s32.totalorder %s1431_s30, 1  ;;  %s1431_s30 = sphi %s1486_s30, %s19_s30  }
   0x2   : > { %p304_p1 = scmp.lt.s32.totalorder %s1431_s30, 3 }
   0x4   : > { %p305_p2 = pnand %p1001_p0, %p304_p1 }
   0x5   : > { %v1413_v0 = vld [vmem:[%s1744_s3] sm:$0xff] (!%p305_p2)   ;;  %v1433_v1 = vmov (!%p305_p2), 0.0   ;;  %v1414_v2 = vld [vmem:[%s1744_s3 + $0x8] sm:$0xff] (!%p305_p2)   ;;  %vm1434_vm0 = vmmov (!%p305_p2), 0   ;;  %p346_p3 = scmp.lt.s32.totalorder (!%p305_p2), %s997_s10, 1  ;;  %v1435_v3 = vmov (!%p305_p2), 0.0|0.0  }
   0x6   : > { %308 = sbr.rel (%p305_p2) target bundleno = 1137 (0x471), region = 56  ;;  %1130 = vmatprep.subr.bf16.mxu0 (!%p305_p2), %v1433_v1  ;;  %1146 = vmatprep.mubr.msk.bf16.mxu0 (!%p305_p2), %vm1434_vm0, %v1433_v1  ;;  %v1415_v4 = vld [vmem:[%s1744_s3 + $0x10] sm:$0xff] (!%p305_p2)   ;;  %v494_v5 = vld [vmem:[%s1746_s5] sm:$0xff] (!%p305_p2)  ;;  %v495_v6 = vld [vmem:[%s1746_s5 + $0x8] sm:$0xff] (!%p305_p2)  ;;  %vm600_vm1 = vcmask (!%p305_p2), 31744  }
   0x7   : > { %1131 = vmatpush3.bf16.msra.mxu0 (!%p305_p2), %v1413_v0  ;;  %1182 = vmatprep.mubr.msk.f32.mxu1 (!%p305_p2), %vm1434_vm0, %v1433_v1  ;;  %v496_v7 = vld [vmem:[%s1746_s5 + $0x10] sm:$0xff] (!%p305_p2)  ;;  %v1416_v8 = vld [vmem:[%s1744_s3 + $0x18] sm:$0xff] (!%p305_p2)   ;;  %v1526_v9 = vpack.c.bf16 (!%p305_p2), %v495_v6, %v494_v5  ;;  %v498_v12 = vld [vmem:[%s1746_s5 + $0x20] sm:$0xff] (!%p305_p2) }
   0x8   : > { %1132 = vmatprep.subr.bf16.mxu0 (!%p305_p2), %v1433_v1  ;;  %1290 = vmatprep.subr.bf16.mxu1 (!%p305_p2), %v1435_v3  ;;  %v497_v10 = vld [vmem:[%s1746_s5 + $0x18] sm:$0xff] (!%p305_p2)  ;;  %v499_v13 = vld [vmem:[%s1746_s5 + $0x28] sm:$0xff] (!%p305_p2)  ;;  %v1417_v14 = vld [vmem:[%s1744_s3 + $0x20] sm:$0xff] (!%p305_p2)  }
   0x9   : > { %1292 = vmatpush3.bf16.msra.mxu1 (!%p305_p2), %v1526_v9  ;;  %v1294_v11 = vpack.c.bf16 (!%p305_p2), %v497_v10, %v496_v7  ;;  %v1297_v16 = vpack.c.bf16 (!%p305_p2), %v499_v13, %v498_v12  ;;  %v500_v18 = vld [vmem:[%s1746_s5 + $0x30] sm:$0xff] (!%p305_p2)  ;;  %v501_v19 = vld [vmem:[%s1746_s5 + $0x38] sm:$0xff] (!%p305_p2)  ;;  %v1418_v20 = vld [vmem:[%s1744_s3 + $0x28] sm:$0xff] (!%p305_p2)  }
   0xa   : > { %1293 = vmatprep.subr.bf16.mxu1 (!%p305_p2), %v1435_v3  ;;  %v1006_v21 = vld [vmem:[%s1742_s1] ss:$0 sm:$0xff] (!%p305_p2)  ;;  %v1300_v22 = vpack.c.bf16 (!%p305_p2), %v501_v19, %v500_v18  ;;  %v503_v25 = vld [vmem:[%s1746_s5 + $0x48] sm:$0xff] (!%p305_p2)  ;;  %v1419_v26 = vld [vmem:[%s1744_s3 + $0x30] sm:$0xff] (!%p305_p2)  }
   0xb   : > { %1133 = vmatpush3.bf16.msra.mxu0 (!%p305_p2), %v1414_v2  ;;  %v502_v24 = vld [vmem:[%s1746_s5 + $0x40] sm:$0xff] (!%p305_p2)  ;;  %v504_v30 = vld [vmem:[%s1746_s5 + $0x50] sm:$0xff] (!%p305_p2)  ;;  %v505_v31 = vld [vmem:[%s1746_s5 + $0x58] sm:$0xff] (!%p305_p2) }
   0xc   : > { %1134 = vmatprep.subr.bf16.mxu0 (!%p305_p2), %v1433_v1  ;;  %v1007_v27 = vld [vmem:[%s1743_s2] ss:$0 sm:$0xff] (!%p305_p2)  ;;  %v1303_v28 = vpack.c.bf16 (!%p305_p2), %v503_v25, %v502_v24  ;;  %v1420_v32 = vld [vmem:[%s1744_s3 + $0x38] sm:$0xff] (!%p305_p2)   ;;  %v1306_v33 = vpack.c.bf16 (!%p305_p2), %v505_v31, %v504_v30  ;;  %v507_v36 = vld [vmem:[%s1746_s5 + $0x68] sm:$0xff] (!%p305_p2) }
   0xd   : > { %s1754_s10 = smov (!%p346_p3, %s997_s10), 1  ;;  %1295 = vmatpush3.bf16.msra.mxu1 %v1294_v11  ;;  %v506_v35 = vld [vmem:[%s1746_s5 + $0x60] sm:$0xff]  ;;  %v508_v38 = vld [vmem:[%s1746_s5 + $0x70] sm:$0xff]  ;;  %v509_v39 = vld [vmem:[%s1746_s5 + $0x78] sm:$0xff] }
   0xe   : > { %s1002_s17 = sshll.u32 %s1754_s10, 2  ;;  %1296 = vmatprep.subr.bf16.mxu1 %v1435_v3  ;;  %v1309_v37 = vpack.c.bf16 %v507_v36, %v506_v35  ;;  %v1312_v40 = vpack.c.bf16 %v509_v39, %v508_v38  ;;  %vm1607_vm2 = vmpackc.low %vm600_vm1, %vm600_vm1  ;;  %s1636_s29 = sshll.u32 %s1754_s10, 3  ;;  %v1008_v42 = vld [vmem:[%s1745_s4] ss:$0 sm:$0xff]  ;;  %v511_v52 = vld [vmem:[%s1747_s6 + $0x8] sm:$0xff] }
   0xf   : > { %1135 = vmatpush3.bf16.msra.mxu0 %v1415_v4  ;;  %s349_s11 = scalar_lea.vmem %s1741_s0, %s1002_s17  ;;  %s353_s15 = scalar_lea.vmem %s1748_s7, %s1636_s29  ;;  %v510_v51 = vld [vmem:[%s1747_s6] sm:$0xff]  ;;  %v512_v53 = vld [vmem:[%s1747_s6 + $0x10] sm:$0xff]  ;;  %v513_v55 = vld [vmem:[%s1747_s6 + $0x18] sm:$0xff] }
  0x10   : > { %1136 = vmatprep.subr.bf16.mxu0 %v1433_v1  ;;  %v363_v15 = vld [vmem:[%s349_s11] sm:$0xf]  ;;  %v1347_v54 = vpack.c.bf16 %v511_v52, %v510_v51  ;;  %v1350_v56 = vpack.c.bf16 %v513_v55, %v512_v53  ;;  %v515_v58 = vld [vmem:[%s1747_s6 + $0x28] sm:$0xff]  ;;  %v516_v60 = vld [vmem:[%s1747_s6 + $0x30] sm:$0xff]  ;;  %s357_s12 = scalar_lea.vmem %s1749_s8, %s1636_s29 }
  0x11   : > { %v364_v17 = vunpack.c.l.bf16 %v363_v15  ;;  %1298 = vmatpush3.bf16.msra.mxu1 %v1297_v16  ;;  %v526_v46 = vld [vmem:[%s353_s15] sm:$0xff]  ;;  %v517_v61 = vld [vmem:[%s1747_s6 + $0x38] sm:$0xff]  ;;  %v519_v0 = vld [vmem:[%s1747_s6 + $0x48] sm:$0xff]  ;;  %s361_s15 = scalar_lea.vmem %s1750_s9, %s1636_s29 }
  0x12   : > { %1299 = vmatprep.subr.bf16.mxu1 %v1435_v3  ;;  %v514_v57 = vld [vmem:[%s1747_s6 + $0x20] sm:$0xff]  ;;  %v1356_v62 = vpack.c.bf16 %v517_v61, %v516_v60  ;;  %v520_v4 = vld [vmem:[%s1747_s6 + $0x50] sm:$0xff]  ;;  %v521_v5 = vld [vmem:[%s1747_s6 + $0x58] sm:$0xff] }
  0x13   : > { %1137 = vmatpush3.bf16.msra.mxu0 %v1416_v8  ;;  %v372_v23 = vsub.f32 %v364_v17, %v1006_v21  ;;  %v1353_v59 = vpack.c.bf16 %v515_v58, %v514_v57  ;;  %v518_v63 = vld [vmem:[%s1747_s6 + $0x40] sm:$0xff]  ;;  %v1362_v6 = vpack.c.bf16 %v521_v5, %v520_v4  ;;  %v523_v8 = vld [vmem:[%s1747_s6 + $0x68] sm:$0xff]  ;;  %v525_v15 = vld [vmem:[%s1747_s6 + $0x78] sm:$0xff] }
  0x14   : > { %1138 = vmatprep.subr.bf16.mxu0 %v1433_v1  ;;  %v1359_v2 = vpack.c.bf16 %v519_v0, %v518_v63  ;;  %v522_v7 = vld [vmem:[%s1747_s6 + $0x60] sm:$0xff] }
  0x15   : > { %1301 = vmatpush3.bf16.msra.mxu1 %v1300_v22  ;;  %v380_v29 = vmul.f32 %v1007_v27, %v372_v23  ;;  %v723_v18 = vld [vmem:[%s357_s12] sm:$0xff] }
  0x16   : > { %1302 = vmatprep.subr.bf16.mxu1 %v1435_v3 }
  0x17   : > { %1139 = vmatpush3.bf16.msra.mxu0 %v1417_v14  ;;  %v381_v34 = vpack.c.bf16 %v380_v29, %v380_v29  ;;  %v524_v14 = vld [vmem:[%s1747_s6 + $0x70] sm:$0xff] }
  0x18   : > { %1140 = vmatprep.subr.bf16.mxu0 %v1433_v1 }
  0x19   : > { %1304 = vmatpush3.bf16.msra.mxu1 %v1303_v28 }
  0x1a   : > { %1305 = vmatprep.subr.bf16.mxu1 %v1435_v3 }
  0x1b   : > { %1141 = vmatpush3.bf16.msra.mxu0 %v1418_v20 }
  0x1c   : > { %1142 = vmatprep.subr.bf16.mxu0 %v1433_v1 }
  0x1d   : > { %1307 = vmatpush3.bf16.msra.mxu1 %v1306_v33 }
  0x1e   : > { %1308 = vmatprep.subr.bf16.mxu1 %v1435_v3 }
  0x1f   : > { %1143 = vmatpush3.bf16.msra.mxu0 %v1419_v26 }
  0x20   : > { %1144 = vmatprep.subr.bf16.mxu0 %v1433_v1 }
  0x21   : > { %1310 = vmatpush3.bf16.msra.mxu1 %v1309_v37 }
  0x22   : > { %1311 = vmatprep.subr.bf16.mxu1 %v1435_v3 }
  0x23   : > { %1145 = vmatpush3.bf16.msra.mxu0 %v1420_v32 }
  0x24   : > { %1314 = vmatprep.subr.bf16.mxu0 %v1435_v3 }
  0x25   : > { %1313 = vmatpush3.bf16.msra.mxu1 %v1312_v40 }
  0x26   : > { %1147 = vmatmul.mubr.bf16.vlgmr.msra.gmra.mrb[0].mxu0 %v381_v34  ;;  %1346 = vmatprep.subr.bf16.mxu1 %v1435_v3 }
  0x27   : > { %1217 = vmatprep.mubr.msk.f32.mxu0 %vm1434_vm0, %v1433_v1 }
  0x2c   : > { %1317 = vmatpush3.bf16.xpose.msk.msra.mxu0 %vm1607_vm2, %v1526_v9  ;;  %v1365_v9 = vpack.c.bf16 %v523_v8, %v522_v7 }
  0x2d   : > { %1318 = vmatprep.subr.bf16.mxu0 %v1435_v3 }
  0x34   : > { %1321 = vmatpush3.bf16.xpose.msk.msra.mxu0 %vm1607_vm2, %v1294_v11 }
  0x35   : > { %1322 = vmatprep.subr.bf16.mxu0 %v1435_v3 }
  0x3c   : > { %1325 = vmatpush3.bf16.xpose.msk.msra.mxu0 %vm1607_vm2, %v1297_v16  ;;  %v1368_v16 = vpack.c.bf16 %v525_v15, %v524_v14 }
  0x3d   : > { %1326 = vmatprep.subr.bf16.mxu0 %v1435_v3 }
  0x44   : > { %1329 = vmatpush3.bf16.xpose.msk.msra.mxu0 %vm1607_vm2, %v1300_v22 }
  0x45   : > { %1330 = vmatprep.subr.bf16.mxu0 %v1435_v3 }
  0x4c   : > { %1333 = vmatpush3.bf16.xpose.msk.msra.mxu0 %vm1607_vm2, %v1303_v28 }
  0x4d   : > { %1334 = vmatprep.subr.bf16.mxu0 %v1435_v3 }
  0x54   : > { %1337 = vmatpush3.bf16.xpose.msk.msra.mxu0 %vm1607_vm2, %v1306_v33 }
  0x55   : > { %1338 = vmatprep.subr.bf16.mxu0 %v1435_v3 }
  0x5c   : > { %1341 = vmatpush3.bf16.xpose.msk.msra.mxu0 %vm1607_vm2, %v1309_v37 }
  0x5d   : > { %1342 = vmatprep.subr.bf16.mxu0 %v1435_v3 }
  0x64   : > { %1345 = vmatpush3.bf16.xpose.msk.msra.mxu0 %vm1607_vm2, %v1312_v40 }
  0xf9   : > { %v487_v43 = vpop.f32.mrb[0].mxu0 }
  0xfa   : > { %v488_v44 = vadd.f32 %v1008_v42, %v487_v43  ;;  %v1148_v45 = vpop.f32.mrb[1].mxu0 }
  0xfb   : > { %v490_v47 = vpop.f32.mrb[2].mxu0 }
  0xfc   : > { %v493_v48 = vmax.f32 %v488_v44, 0.0  ;;  %v1149_v49 = vpop.f32.mrb[3].mxu0 }
  0xfe   : > { %v527_v50 = vadd.f32 %v526_v46, %v493_v48 }
 0x100   : > { %1183 = vmatmul.mubr.f32.vlgmr.msra.gmra.mrb[0].mxu1 %v527_v50 }
 0x101   : > { %1252 = vmatprep.mubr.msk.f32.mxu1 %vm1434_vm0, %v1433_v1  ;;  %1348 = vmatpush3.bf16.msra.mxu1 %v1347_v54 }
 0x102   : > { %1349 = vmatprep.subr.bf16.mxu1 %v1435_v3 }
 0x105   : > { %1351 = vmatpush3.bf16.msra.mxu1 %v1350_v56 }
 0x106   : > { %1352 = vmatprep.subr.bf16.mxu1 %v1435_v3 }
 0x109   : > { %1354 = vmatpush3.bf16.msra.mxu1 %v1353_v59 }
 0x10a   : > { %1355 = vmatprep.subr.bf16.mxu1 %v1435_v3 }
 0x10d   : > { %1357 = vmatpush3.bf16.msra.mxu1 %v1356_v62 }
 0x10e   : > { %1358 = vmatprep.subr.bf16.mxu1 %v1435_v3 }
 0x111   : > { %1360 = vmatpush3.bf16.msra.mxu1 %v1359_v2 }
 0x112   : > { %1361 = vmatprep.subr.bf16.mxu1 %v1435_v3 }
 0x115   : > { %1363 = vmatpush3.bf16.msra.mxu1 %v1362_v6 }
 0x116   : > { %1364 = vmatprep.subr.bf16.mxu1 %v1435_v3 }
 0x119   : > { %1366 = vmatpush3.bf16.msra.mxu1 %v1365_v9 }
 0x11a   : > { %1367 = vmatprep.subr.bf16.mxu1 %v1435_v3 }
 0x11d   : > { %1369 = vmatpush3.bf16.msra.mxu1 %v1368_v16 }
 0x11e   : > { %1370 = vmatprep.subr.bf16.mxu1 %v1435_v3 }
 0x1d3   : > { %v594_v10 = vpop.f32.mrb[0].mxu1 }
 0x1d4   : > { %v598_v11 = vmax.f32 %v594_v10, 1e-12  ;;  %v1184_v12 = vpop.f32.mrb[1].mxu1 }
 0x1d6   : > { %1421 = vrcp.f32 %v598_v11 }
 0x1e0   : > { %v1422_v13 = vpop.eup %1421 }
 0x1e1   : > { %1218 = vmatmul.mubr.msk.f32.vlgmr.msra.gmra.mrb[4].mxu0 %vm600_vm1, %v1422_v13 }
 0x2b4   : > { %v718_v17 = vpop.f32.mrb[4].mxu0 }
 0x2b5   : > { %v722_v19 = vmul.f32 %v718_v17, %v527_v50  ;;  %v1219_v20 = vpop.f32.mrb[5].mxu0 }
 0x2b7   : > { %v724_v21 = vadd.f32 %v723_v18, %v722_v19 }
 0x2b9   : > { %1253 = vmatmul.mubr.f32.vlgmr.msra.gmra.mrb[2].mxu1 %v724_v21 }
 0x2ba   : > { %1373 = vmatpush3.bf16.xpose.msk.msra.mxu1 %vm1607_vm2, %v1347_v54  ;;  %1287 = vmatprep.mubr.msk.f32.mxu1 %vm1434_vm0, %v1433_v1 }
 0x2bb   : > { %1374 = vmatprep.subr.bf16.mxu1 %v1435_v3 }
 0x2c2   : > { %1377 = vmatpush3.bf16.xpose.msk.msra.mxu1 %vm1607_vm2, %v1350_v56 }
 0x2c3   : > { %1378 = vmatprep.subr.bf16.mxu1 %v1435_v3 }
 0x2ca   : > { %1381 = vmatpush3.bf16.xpose.msk.msra.mxu1 %vm1607_vm2, %v1353_v59 }
 0x2cb   : > { %1382 = vmatprep.subr.bf16.mxu1 %v1435_v3 }
 0x2d2   : > { %1385 = vmatpush3.bf16.xpose.msk.msra.mxu1 %vm1607_vm2, %v1356_v62 }
 0x2d3   : > { %1386 = vmatprep.subr.bf16.mxu1 %v1435_v3 }
 0x2da   : > { %1389 = vmatpush3.bf16.xpose.msk.msra.mxu1 %vm1607_vm2, %v1359_v2 }
 0x2db   : > { %1390 = vmatprep.subr.bf16.mxu1 %v1435_v3 }
 0x2e2   : > { %1393 = vmatpush3.bf16.xpose.msk.msra.mxu1 %vm1607_vm2, %v1362_v6 }
 0x2e3   : > { %1394 = vmatprep.subr.bf16.mxu1 %v1435_v3 }
 0x2ea   : > { %1397 = vmatpush3.bf16.xpose.msk.msra.mxu1 %vm1607_vm2, %v1365_v9 }
 0x2eb   : > { %1398 = vmatprep.subr.bf16.mxu1 %v1435_v3 }
 0x2f2   : > { %1401 = vmatpush3.bf16.xpose.msk.msra.mxu1 %vm1607_vm2, %v1368_v16 }
 0x38c   : > { %v791_v1 = vpop.f32.mrb[2].mxu1 }
 0x38d   : > { %v795_v22 = vmax.f32 %v791_v1, 1e-12  ;;  %v1254_v23 = vpop.f32.mrb[3].mxu1 }
 0x38f   : > { %1423 = vrcp.f32 %v795_v22 }
 0x399   : > { %v1424_v24 = vpop.eup %1423 }
 0x39a   : > { %1288 = vmatmul.mubr.msk.f32.vlgmr.msra.gmra.mrb[4].mxu1 %vm600_vm1, %v1424_v24 }
 0x46d   : > { %v914_v25 = vpop.f32.mrb[4].mxu1 }
 0x46e   : > { %v918_v26 = vmul.f32 %v914_v25, %v724_v21  ;;  %v1289_v27 = vpop.f32.mrb[5].mxu1 }
 0x470   : > { %919 = vst [vmem:[%s361_s15] sm:$0xff] %v918_v26 }
 0x471 PF: > { %s19_s30 = sadd.s32 1, %s1431_s30  }
 0x472   : > { %p16_p4 = scmp.ge.s32.totalorder %s19_s30, 4  }
 0x474   :  { %18 = sbr.rel (!%p16_p4) target bundleno = 1 (0x1), region = 92 }

</bundles_post_ra>
